<compile_context>
chip_gen: v7x
topology: tpu7x:2x2x1
jax: 0.10.0
libtpu: 0.0.40
codegen_flags: <defaults>
</compile_context>

<pallas_src>
import math
from functools import partial

import jax
import jax.numpy as jnp
from jax.experimental import pallas as pl
from jax.experimental.pallas import tpu as pltpu

LOG_2PI = math.log(2.0 * math.pi)


# ------------------------------- kernel ----------------------------------
def nf_forward_kernel(xt_ref, w1t_ref, b1t_ref, wstt_ref, bstt_ref,
                      zst_ref, stats_ref, *, store_all):
    """Fused normalizing-flow forward over one batch tile (batch on lanes).

    xt_ref   : (D, TB)            input tile, transposed (feature, batch)
    w1t_ref  : (K, H, HALF)       W1^T per flow    b1t_ref : (K, H, 1)
    wstt_ref : (K, 2*HALF, H)     [Ws|Wt]^T fused  bstt_ref: (K, 2*HALF, 1)
    zst_ref  : (K+1, D, TB)       all z's (zs[0]==x), or (1, D, TB) if
                                  store_all=False (final z only)
    stats_ref: (2, TB)            row 0 = prior log-prob, row 1 = log_det
    """
    D, TB = xt_ref.shape
    HALF = D // 2
    K = w1t_ref.shape[0]

    x = xt_ref[...]                               # (D, TB)
    x_lo = x[:HALF, :]                            # carry halves separately
    x_hi = x[HALF:, :]
    if store_all:
        zst_ref[0] = x

    log_det = jnp.zeros((1, TB), jnp.float32)

    for k in range(K):                            # unrolled at trace time
        if k % 2 == 0:
            x0, x1 = x_lo, x_hi                   # x0 pass-through, x1 transformed
        else:
            x0, x1 = x_hi, x_lo

        # conditioner MLP, batch on the MXU output/lane dim
        h = jnp.tanh(
            jnp.dot(w1t_ref[k], x0, preferred_element_type=jnp.float32)
            + b1t_ref[k])                         # (H, TB)
        st = (jnp.dot(wstt_ref[k], h, preferred_element_type=jnp.float32)
              + bstt_ref[k])                      # (2*HALF, TB) = [s ; t]
        s = st[:HALF, :]
        t = st[HALF:, :]

        y1 = x1 * jnp.exp(s) + t
        if k % 2 == 0:
            x_hi = y1
        else:
            x_lo = y1

        log_det = log_det + jnp.sum(s, axis=0, keepdims=True)   # (1, TB)

        if store_all:
            # full-lane sublane-range stores (no masked vst)
            zst_ref[k + 1, :HALF, :] = x_lo
            zst_ref[k + 1, HALF:, :] = x_hi

    if not store_all:
        zst_ref[0, :HALF, :] = x_lo
        zst_ref[0, HALF:, :] = x_hi

    # standard-normal prior log-prob on the final z (lane-dense (1, TB) rows)
    sumsq = jnp.sum(x_lo * x_lo + x_hi * x_hi, axis=0, keepdims=True)
    stats_ref[0:1, :] = -0.5 * sumsq - 0.5 * D * LOG_2PI
    stats_ref[1:2, :] = log_det


# ------------------------------- wrapper ----------------------------------
def normalizing_flow_model_forward(x, params, *, store_intermediates=True,
                                   tb=None):
    """Returns (zs (K+1,B,D) [or (1,B,D) if store_intermediates=False],
                prior_logprob (B,), log_det (B,))."""
    w1, b1, ws, bs, wt, bt = params
    K, HALF, H = w1.shape
    D = 2 * HALF
    B = x.shape[0]

    # Batch-on-lanes weights: pre-transpose + fuse the s/t heads so each flow
    # is two MXU passes producing 128-lane-dense results.
    w1t = jnp.transpose(w1, (0, 2, 1))                      # (K, H, HALF)
    b1t = jnp.transpose(b1, (0, 2, 1))                      # (K, H, 1)
    wstt = jnp.concatenate([jnp.transpose(ws, (0, 2, 1)),
                            jnp.transpose(wt, (0, 2, 1))], axis=1)  # (K, 2*HALF, H)
    bstt = jnp.concatenate([jnp.transpose(bs, (0, 2, 1)),
                            jnp.transpose(bt, (0, 2, 1))], axis=1)  # (K, 2*HALF, 1)

    # Lane-axis batch tile: multiple of 128, grows with B to amortize the
    # per-grid-step overhead, but keeps >=2 grid steps (>=1 per v7x TC).
    if tb is None:
        tb = max(128, min(1024, pl.next_power_of_2(max(B, 1)) // 4))
    TB = tb
    B_pad = pl.cdiv(B, TB) * TB

    xt = x.T                                                # (D, B)
    if B_pad != B:
        # TODO(synk): handle the ragged batch tail inside the kernel instead
        # of padding/slicing (extra HBM pass); pick B % TB == 0 when possible.
        xt = jnp.pad(xt, ((0, 0), (0, B_pad - B)))
    grid = (B_pad // TB,)

    n_z = K + 1 if store_intermediates else 1
    const3 = lambda i: (0, 0, 0)                            # resident weights

    # VMEM budget (double-buffered x/zs/stats blocks + resident weights),
    # with headroom; stays far below v7x's 64 MiB.
    f32 = 4
    blk_bytes = (D * TB + n_z * D * TB + 2 * TB) * f32
    w_bytes = K * (HALF * H + H + 2 * HALF * H + 2 * HALF) * f32
    vmem_limit = int(min(128 * 1024 * 1024,
                         max(4 * 1024 * 1024, 4 * blk_bytes + 2 * w_bytes)))

    zs_t, stats = pl.pallas_call(
        partial(nf_forward_kernel, store_all=store_intermediates),
        out_shape=(
            jax.ShapeDtypeStruct((n_z, D, B_pad), jnp.float32),
            jax.ShapeDtypeStruct((2, B_pad), jnp.float32),
        ),
        grid=grid,
        in_specs=[
            pl.BlockSpec((D, TB), lambda i: (0, i)),        # x^T, lane-tiled
            pl.BlockSpec((K, H, HALF), const3),             # W1^T
            pl.BlockSpec((K, H, 1), const3),                # b1^T
            pl.BlockSpec((K, 2 * HALF, H), const3),         # [Ws|Wt]^T
            pl.BlockSpec((K, 2 * HALF, 1), const3),         # [bs|bt]^T
        ],
        out_specs=(
            pl.BlockSpec((n_z, D, TB), lambda i: (0, 0, i)),  # zs (feature, batch)
            pl.BlockSpec((2, TB), lambda i: (0, i)),          # [prior_lp; log_det]
        ),
        compiler_params=pltpu.CompilerParams(
            dimension_semantics=("parallel",),              # v7x: 2 TCs split grid
            vmem_limit_bytes=vmem_limit),
    )(xt, w1t, b1t, wstt, bstt)

    if B_pad != B:
        zs_t = zs_t[:, :, :B]
        stats = stats[:, :B]
    zs = jnp.transpose(zs_t, (0, 2, 1))                     # (n_z, B, D), PyTorch layout
    return zs, stats[0], stats[1]


# ------------------------- pure-JAX reference -----------------------------
def reference_forward(x, params):
    w1, b1, ws, bs, wt, bt = params
    K, HALF, _ = w1.shape
    B = x.shape[0]
    D = 2 * HALF
    log_det = jnp.zeros((B,), jnp.float32)
    zs = [x]
    for k in range(K):
        if k % 2 == 0:
            x0, x1 = x[:, :HALF], x[:, HALF:]
        else:
            x0, x1 = x[:, HALF:], x[:, :HALF]
        h = jnp.tanh(x0 @ w1[k] + b1[k])
        s = h @ ws[k] + bs[k]
        t = h @ wt[k] + bt[k]
        y1 = x1 * jnp.exp(s) + t
        x = jnp.concatenate([x0, y1] if k % 2 == 0 else [y1, x0], axis=1)
        log_det = log_det + jnp.sum(s, axis=1)
        zs.append(x)
    prior_lp = -0.5 * jnp.sum(x * x, axis=1) - 0.5 * D * LOG_2PI
    return jnp.stack(zs, axis=0), prior_lp, log_det


# --------------------------------- main ------------------------------------
if __name__ == "__main__":
    # problem sizes (small, but a batch large enough to exercise the lane-tiled
    # parallel grid: TB=256 lanes -> 4 grid steps, 2 per v7x TensorCore)
    B = 1024       # batch (m)
    D = 16         # feature dim (even, for the coupling split)
    HALF = D // 2
    H = 32         # conditioner hidden width
    K = 4          # number of flows

    key = jax.random.PRNGKey(0)
    kx, kw1, kb1, kws, kbs, kwt, kbt = jax.random.split(key, 7)

    # deterministic parameter init (small scale keeps exp(s) well-behaved)
    w1 = 0.1 * jax.random.normal(kw1, (K, HALF, H), jnp.float32)
    b1 = 0.1 * jax.random.normal(kb1, (K, 1, H), jnp.float32)
    ws = 0.1 * jax.random.normal(kws, (K, H, HALF), jnp.float32)
    bs = 0.1 * jax.random.normal(kbs, (K, 1, HALF), jnp.float32)
    wt = 0.1 * jax.random.normal(kwt, (K, H, HALF), jnp.float32)
    bt = 0.1 * jax.random.normal(kbt, (K, 1, HALF), jnp.float32)
    params = (w1, b1, ws, bs, wt, bt)

    x = jax.random.normal(kx, (B, D), jnp.float32)

    # full forward (matches the PyTorch module: all zs + prior_logprob + log_det)
    zs, prior_lp, log_det = normalizing_flow_model_forward(x, params)
    jax.block_until_ready((zs, prior_lp, log_det))

    # correctness check against a pure-JAX reference
    zs_ref, prior_lp_ref, log_det_ref = reference_forward(x, params)
    assert jnp.allclose(zs, zs_ref, atol=1e-4), "zs mismatch"
    assert jnp.allclose(prior_lp, prior_lp_ref, atol=1e-4), "prior_logprob mismatch"
    assert jnp.allclose(log_det, log_det_ref, atol=1e-4), "log_det mismatch"

    # write-light variant: skip intermediate-zs writeback (~K x less HBM write)
    z_fin, prior_lp2, log_det2 = normalizing_flow_model_forward(
        x, params, store_intermediates=False)
    jax.block_until_ready((z_fin, prior_lp2, log_det2))
    assert jnp.allclose(z_fin[0], zs_ref[-1], atol=1e-4), "final z mismatch"
    assert jnp.allclose(prior_lp2, prior_lp_ref, atol=1e-4), "prior_logprob mismatch (light)"
    assert jnp.allclose(log_det2, log_det_ref, atol=1e-4), "log_det mismatch (light)"

    print("KERNEL_OK")
</pallas_src>

<mosaic_0001>
module attributes {stable_mosaic.version = 11 : i64} {
  func.func @nf_forward_kernel(%arg0: i32, %arg1: memref<16x256xf32, #tpu.memory_space<vmem>>, %arg2: memref<4x32x8xf32, #tpu.memory_space<vmem>>, %arg3: memref<4x32x1xf32, #tpu.memory_space<vmem>>, %arg4: memref<4x16x32xf32, #tpu.memory_space<vmem>>, %arg5: memref<4x16x1xf32, #tpu.memory_space<vmem>>, %arg6: memref<5x16x256xf32, #tpu.memory_space<vmem>>, %arg7: memref<2x256xf32, #tpu.memory_space<vmem>>) attributes {dimension_semantics = [#tpu.dimension_semantics<parallel>], iteration_bounds = array<i64: 4>, scalar_prefetch = 0 : i64, scratch_operands = 0 : i64, tpu.core_type = #tpu.core_type<tc>, window_params = [{transform_indices = @transform_0, window_bounds = array<i64: 16, 256>}, {pipeline_mode = #tpu.pipeline_mode<synchronous>, transform_indices = @transform_1, window_bounds = array<i64: 4, 32, 8>}, {pipeline_mode = #tpu.pipeline_mode<synchronous>, transform_indices = @transform_2, window_bounds = array<i64: 4, 32, 1>}, {pipeline_mode = #tpu.pipeline_mode<synchronous>, transform_indices = @transform_3, window_bounds = array<i64: 4, 16, 32>}, {pipeline_mode = #tpu.pipeline_mode<synchronous>, transform_indices = @transform_4, window_bounds = array<i64: 4, 16, 1>}, {transform_indices = @transform_5, window_bounds = array<i64: 5, 16, 256>}, {transform_indices = @transform_6, window_bounds = array<i64: 2, 256>}]} {
    %c0 = arith.constant 0 : index
    %c0_0 = arith.constant 0 : index
    %0 = vector.load %arg1[%c0, %c0_0] : memref<16x256xf32, #tpu.memory_space<vmem>>, vector<16x256xf32>
    %1 = vector.extract_strided_slice %0 {offsets = [0, 0], sizes = [8, 256], strides = [1, 1]} : vector<16x256xf32> to vector<8x256xf32>
    %2 = vector.extract_strided_slice %0 {offsets = [8, 0], sizes = [8, 256], strides = [1, 1]} : vector<16x256xf32> to vector<8x256xf32>
    %c0_1 = arith.constant 0 : index
    %c0_2 = arith.constant 0 : index
    %c0_3 = arith.constant 0 : index
    %3 = vector.load %arg6[%c0_1, %c0_2, %c0_3] : memref<5x16x256xf32, #tpu.memory_space<vmem>>, vector<1x16x256xf32>
    %4 = vector.shape_cast %3 : vector<1x16x256xf32> to vector<16x256xf32>
    %5 = vector.shape_cast %0 : vector<16x256xf32> to vector<1x16x256xf32>
    tpu.vector_store %arg6[%c0_1, %c0_2, %c0_3], %5 {strides = array<i32>} : memref<5x16x256xf32, #tpu.memory_space<vmem>>, vector<1x16x256xf32>,
    %cst = arith.constant 0.000000e+00 : f32
    %6 = vector.broadcast %cst : f32 to vector<1x256xf32>
    %c0_4 = arith.constant 0 : index
    %c0_5 = arith.constant 0 : index
    %c0_6 = arith.constant 0 : index
    %7 = vector.load %arg2[%c0_4, %c0_5, %c0_6] : memref<4x32x8xf32, #tpu.memory_space<vmem>>, vector<1x32x8xf32>
    %8 = vector.shape_cast %7 : vector<1x32x8xf32> to vector<32x8xf32>
    %cst_7 = arith.constant dense<0.000000e+00> : vector<32x256xf32>
    %9 = tpu.matmul %8, %1, %cst_7 {dimension_numbers = #tpu.dot_dimension_numbers<[1], [0], [0], [1], [0, 0, 1, 1], [], []>} : vector<32x8xf32>, vector<8x256xf32>, vector<32x256xf32> -> vector<32x256xf32>
    %c0_8 = arith.constant 0 : index
    %c0_9 = arith.constant 0 : index
    %c0_10 = arith.constant 0 : index
    %10 = vector.load %arg3[%c0_8, %c0_9, %c0_10] : memref<4x32x1xf32, #tpu.memory_space<vmem>>, vector<1x32x1xf32>
    %11 = vector.shape_cast %10 : vector<1x32x1xf32> to vector<32x1xf32>
    %12 = vector.broadcast %11 : vector<32x1xf32> to vector<32x256xf32>
    %13 = arith.addf %9, %12 : vector<32x256xf32>
    %14 = math.tanh %13 : vector<32x256xf32>
    %c0_11 = arith.constant 0 : index
    %c0_12 = arith.constant 0 : index
    %c0_13 = arith.constant 0 : index
    %15 = vector.load %arg4[%c0_11, %c0_12, %c0_13] : memref<4x16x32xf32, #tpu.memory_space<vmem>>, vector<1x16x32xf32>
    %16 = vector.shape_cast %15 : vector<1x16x32xf32> to vector<16x32xf32>
    %cst_14 = arith.constant dense<0.000000e+00> : vector<16x256xf32>
    %17 = tpu.matmul %16, %14, %cst_14 {dimension_numbers = #tpu.dot_dimension_numbers<[1], [0], [0], [1], [0, 0, 1, 1], [], []>} : vector<16x32xf32>, vector<32x256xf32>, vector<16x256xf32> -> vector<16x256xf32>
    %c0_15 = arith.constant 0 : index
    %c0_16 = arith.constant 0 : index
    %c0_17 = arith.constant 0 : index
    %18 = vector.load %arg5[%c0_15, %c0_16, %c0_17] : memref<4x16x1xf32, #tpu.memory_space<vmem>>, vector<1x16x1xf32>
    %19 = vector.shape_cast %18 : vector<1x16x1xf32> to vector<16x1xf32>
    %20 = vector.broadcast %19 : vector<16x1xf32> to vector<16x256xf32>
    %21 = arith.addf %17, %20 : vector<16x256xf32>
    %22 = vector.extract_strided_slice %21 {offsets = [0, 0], sizes = [8, 256], strides = [1, 1]} : vector<16x256xf32> to vector<8x256xf32>
    %23 = vector.extract_strided_slice %21 {offsets = [8, 0], sizes = [8, 256], strides = [1, 1]} : vector<16x256xf32> to vector<8x256xf32>
    %24 = math.exp %22 : vector<8x256xf32>
    %25 = arith.mulf %2, %24 : vector<8x256xf32>
    %26 = arith.addf %25, %23 : vector<8x256xf32>
    %cst_18 = arith.constant dense<0.000000e+00> : vector<256xf32>
    %27 = vector.multi_reduction <add>, %22, %cst_18 [0] : vector<8x256xf32> to vector<256xf32>
    %28 = vector.shape_cast %27 : vector<256xf32> to vector<1x256xf32>
    %29 = arith.addf %6, %28 : vector<1x256xf32>
    %c1 = arith.constant 1 : index
    %c0_19 = arith.constant 0 : index
    %c0_20 = arith.constant 0 : index
    %30 = vector.load %arg6[%c1, %c0_19, %c0_20] : memref<5x16x256xf32, #tpu.memory_space<vmem>>, vector<1x8x256xf32>
    %31 = vector.shape_cast %30 : vector<1x8x256xf32> to vector<8x256xf32>
    %32 = vector.shape_cast %1 : vector<8x256xf32> to vector<1x8x256xf32>
    tpu.vector_store %arg6[%c1, %c0_19, %c0_20], %32 {strides = array<i32>} : memref<5x16x256xf32, #tpu.memory_space<vmem>>, vector<1x8x256xf32>,
    %c1_21 = arith.constant 1 : index
    %c8 = arith.constant 8 : index
    %c0_22 = arith.constant 0 : index
    %33 = vector.load %arg6[%c1_21, %c8, %c0_22] : memref<5x16x256xf32, #tpu.memory_space<vmem>>, vector<1x8x256xf32>
    %34 = vector.shape_cast %33 : vector<1x8x256xf32> to vector<8x256xf32>
    %35 = vector.shape_cast %26 : vector<8x256xf32> to vector<1x8x256xf32>
    tpu.vector_store %arg6[%c1_21, %c8, %c0_22], %35 {strides = array<i32>} : memref<5x16x256xf32, #tpu.memory_space<vmem>>, vector<1x8x256xf32>,
    %c1_23 = arith.constant 1 : index
    %c0_24 = arith.constant 0 : index
    %c0_25 = arith.constant 0 : index
    %36 = vector.load %arg2[%c1_23, %c0_24, %c0_25] : memref<4x32x8xf32, #tpu.memory_space<vmem>>, vector<1x32x8xf32>
    %37 = vector.shape_cast %36 : vector<1x32x8xf32> to vector<32x8xf32>
    %cst_26 = arith.constant dense<0.000000e+00> : vector<32x256xf32>
    %38 = tpu.matmul %37, %26, %cst_26 {dimension_numbers = #tpu.dot_dimension_numbers<[1], [0], [0], [1], [0, 0, 1, 1], [], []>} : vector<32x8xf32>, vector<8x256xf32>, vector<32x256xf32> -> vector<32x256xf32>
    %c1_27 = arith.constant 1 : index
    %c0_28 = arith.constant 0 : index
    %c0_29 = arith.constant 0 : index
    %39 = vector.load %arg3[%c1_27, %c0_28, %c0_29] : memref<4x32x1xf32, #tpu.memory_space<vmem>>, vector<1x32x1xf32>
    %40 = vector.shape_cast %39 : vector<1x32x1xf32> to vector<32x1xf32>
    %41 = vector.broadcast %40 : vector<32x1xf32> to vector<32x256xf32>
    %42 = arith.addf %38, %41 : vector<32x256xf32>
    %43 = math.tanh %42 : vector<32x256xf32>
    %c1_30 = arith.constant 1 : index
    %c0_31 = arith.constant 0 : index
    %c0_32 = arith.constant 0 : index
    %44 = vector.load %arg4[%c1_30, %c0_31, %c0_32] : memref<4x16x32xf32, #tpu.memory_space<vmem>>, vector<1x16x32xf32>
    %45 = vector.shape_cast %44 : vector<1x16x32xf32> to vector<16x32xf32>
    %cst_33 = arith.constant dense<0.000000e+00> : vector<16x256xf32>
    %46 = tpu.matmul %45, %43, %cst_33 {dimension_numbers = #tpu.dot_dimension_numbers<[1], [0], [0], [1], [0, 0, 1, 1], [], []>} : vector<16x32xf32>, vector<32x256xf32>, vector<16x256xf32> -> vector<16x256xf32>
    %c1_34 = arith.constant 1 : index
    %c0_35 = arith.constant 0 : index
    %c0_36 = arith.constant 0 : index
    %47 = vector.load %arg5[%c1_34, %c0_35, %c0_36] : memref<4x16x1xf32, #tpu.memory_space<vmem>>, vector<1x16x1xf32>
    %48 = vector.shape_cast %47 : vector<1x16x1xf32> to vector<16x1xf32>
    %49 = vector.broadcast %48 : vector<16x1xf32> to vector<16x256xf32>
    %50 = arith.addf %46, %49 : vector<16x256xf32>
    %51 = vector.extract_strided_slice %50 {offsets = [0, 0], sizes = [8, 256], strides = [1, 1]} : vector<16x256xf32> to vector<8x256xf32>
    %52 = vector.extract_strided_slice %50 {offsets = [8, 0], sizes = [8, 256], strides = [1, 1]} : vector<16x256xf32> to vector<8x256xf32>
    %53 = math.exp %51 : vector<8x256xf32>
    %54 = arith.mulf %1, %53 : vector<8x256xf32>
    %55 = arith.addf %54, %52 : vector<8x256xf32>
    %cst_37 = arith.constant dense<0.000000e+00> : vector<256xf32>
    %56 = vector.multi_reduction <add>, %51, %cst_37 [0] : vector<8x256xf32> to vector<256xf32>
    %57 = vector.shape_cast %56 : vector<256xf32> to vector<1x256xf32>
    %58 = arith.addf %29, %57 : vector<1x256xf32>
    %c2 = arith.constant 2 : index
    %c0_38 = arith.constant 0 : index
    %c0_39 = arith.constant 0 : index
    %59 = vector.load %arg6[%c2, %c0_38, %c0_39] : memref<5x16x256xf32, #tpu.memory_space<vmem>>, vector<1x8x256xf32>
    %60 = vector.shape_cast %59 : vector<1x8x256xf32> to vector<8x256xf32>
    %61 = vector.shape_cast %55 : vector<8x256xf32> to vector<1x8x256xf32>
    tpu.vector_store %arg6[%c2, %c0_38, %c0_39], %61 {strides = array<i32>} : memref<5x16x256xf32, #tpu.memory_space<vmem>>, vector<1x8x256xf32>,
    %c2_40 = arith.constant 2 : index
    %c8_41 = arith.constant 8 : index
    %c0_42 = arith.constant 0 : index
    %62 = vector.load %arg6[%c2_40, %c8_41, %c0_42] : memref<5x16x256xf32, #tpu.memory_space<vmem>>, vector<1x8x256xf32>
    %63 = vector.shape_cast %62 : vector<1x8x256xf32> to vector<8x256xf32>
    %64 = vector.shape_cast %26 : vector<8x256xf32> to vector<1x8x256xf32>
    tpu.vector_store %arg6[%c2_40, %c8_41, %c0_42], %64 {strides = array<i32>} : memref<5x16x256xf32, #tpu.memory_space<vmem>>, vector<1x8x256xf32>,
    %c2_43 = arith.constant 2 : index
    %c0_44 = arith.constant 0 : index
    %c0_45 = arith.constant 0 : index
    %65 = vector.load %arg2[%c2_43, %c0_44, %c0_45] : memref<4x32x8xf32, #tpu.memory_space<vmem>>, vector<1x32x8xf32>
    %66 = vector.shape_cast %65 : vector<1x32x8xf32> to vector<32x8xf32>
    %cst_46 = arith.constant dense<0.000000e+00> : vector<32x256xf32>
    %67 = tpu.matmul %66, %55, %cst_46 {dimension_numbers = #tpu.dot_dimension_numbers<[1], [0], [0], [1], [0, 0, 1, 1], [], []>} : vector<32x8xf32>, vector<8x256xf32>, vector<32x256xf32> -> vector<32x256xf32>
    %c2_47 = arith.constant 2 : index
    %c0_48 = arith.constant 0 : index
    %c0_49 = arith.constant 0 : index
    %68 = vector.load %arg3[%c2_47, %c0_48, %c0_49] : memref<4x32x1xf32, #tpu.memory_space<vmem>>, vector<1x32x1xf32>
    %69 = vector.shape_cast %68 : vector<1x32x1xf32> to vector<32x1xf32>
    %70 = vector.broadcast %69 : vector<32x1xf32> to vector<32x256xf32>
    %71 = arith.addf %67, %70 : vector<32x256xf32>
    %72 = math.tanh %71 : vector<32x256xf32>
    %c2_50 = arith.constant 2 : index
    %c0_51 = arith.constant 0 : index
    %c0_52 = arith.constant 0 : index
    %73 = vector.load %arg4[%c2_50, %c0_51, %c0_52] : memref<4x16x32xf32, #tpu.memory_space<vmem>>, vector<1x16x32xf32>
    %74 = vector.shape_cast %73 : vector<1x16x32xf32> to vector<16x32xf32>
    %cst_53 = arith.constant dense<0.000000e+00> : vector<16x256xf32>
    %75 = tpu.matmul %74, %72, %cst_53 {dimension_numbers = #tpu.dot_dimension_numbers<[1], [0], [0], [1], [0, 0, 1, 1], [], []>} : vector<16x32xf32>, vector<32x256xf32>, vector<16x256xf32> -> vector<16x256xf32>
    %c2_54 = arith.constant 2 : index
    %c0_55 = arith.constant 0 : index
    %c0_56 = arith.constant 0 : index
    %76 = vector.load %arg5[%c2_54, %c0_55, %c0_56] : memref<4x16x1xf32, #tpu.memory_space<vmem>>, vector<1x16x1xf32>
    %77 = vector.shape_cast %76 : vector<1x16x1xf32> to vector<16x1xf32>
    %78 = vector.broadcast %77 : vector<16x1xf32> to vector<16x256xf32>
    %79 = arith.addf %75, %78 : vector<16x256xf32>
    %80 = vector.extract_strided_slice %79 {offsets = [0, 0], sizes = [8, 256], strides = [1, 1]} : vector<16x256xf32> to vector<8x256xf32>
    %81 = vector.extract_strided_slice %79 {offsets = [8, 0], sizes = [8, 256], strides = [1, 1]} : vector<16x256xf32> to vector<8x256xf32>
    %82 = math.exp %80 : vector<8x256xf32>
    %83 = arith.mulf %26, %82 : vector<8x256xf32>
    %84 = arith.addf %83, %81 : vector<8x256xf32>
    %cst_57 = arith.constant dense<0.000000e+00> : vector<256xf32>
    %85 = vector.multi_reduction <add>, %80, %cst_57 [0] : vector<8x256xf32> to vector<256xf32>
    %86 = vector.shape_cast %85 : vector<256xf32> to vector<1x256xf32>
    %87 = arith.addf %58, %86 : vector<1x256xf32>
    %c3 = arith.constant 3 : index
    %c0_58 = arith.constant 0 : index
    %c0_59 = arith.constant 0 : index
    %88 = vector.load %arg6[%c3, %c0_58, %c0_59] : memref<5x16x256xf32, #tpu.memory_space<vmem>>, vector<1x8x256xf32>
    %89 = vector.shape_cast %88 : vector<1x8x256xf32> to vector<8x256xf32>
    %90 = vector.shape_cast %55 : vector<8x256xf32> to vector<1x8x256xf32>
    tpu.vector_store %arg6[%c3, %c0_58, %c0_59], %90 {strides = array<i32>} : memref<5x16x256xf32, #tpu.memory_space<vmem>>, vector<1x8x256xf32>,
    %c3_60 = arith.constant 3 : index
    %c8_61 = arith.constant 8 : index
    %c0_62 = arith.constant 0 : index
    %91 = vector.load %arg6[%c3_60, %c8_61, %c0_62] : memref<5x16x256xf32, #tpu.memory_space<vmem>>, vector<1x8x256xf32>
    %92 = vector.shape_cast %91 : vector<1x8x256xf32> to vector<8x256xf32>
    %93 = vector.shape_cast %84 : vector<8x256xf32> to vector<1x8x256xf32>
    tpu.vector_store %arg6[%c3_60, %c8_61, %c0_62], %93 {strides = array<i32>} : memref<5x16x256xf32, #tpu.memory_space<vmem>>, vector<1x8x256xf32>,
    %c3_63 = arith.constant 3 : index
    %c0_64 = arith.constant 0 : index
    %c0_65 = arith.constant 0 : index
    %94 = vector.load %arg2[%c3_63, %c0_64, %c0_65] : memref<4x32x8xf32, #tpu.memory_space<vmem>>, vector<1x32x8xf32>
    %95 = vector.shape_cast %94 : vector<1x32x8xf32> to vector<32x8xf32>
    %cst_66 = arith.constant dense<0.000000e+00> : vector<32x256xf32>
    %96 = tpu.matmul %95, %84, %cst_66 {dimension_numbers = #tpu.dot_dimension_numbers<[1], [0], [0], [1], [0, 0, 1, 1], [], []>} : vector<32x8xf32>, vector<8x256xf32>, vector<32x256xf32> -> vector<32x256xf32>
    %c3_67 = arith.constant 3 : index
    %c0_68 = arith.constant 0 : index
    %c0_69 = arith.constant 0 : index
    %97 = vector.load %arg3[%c3_67, %c0_68, %c0_69] : memref<4x32x1xf32, #tpu.memory_space<vmem>>, vector<1x32x1xf32>
    %98 = vector.shape_cast %97 : vector<1x32x1xf32> to vector<32x1xf32>
    %99 = vector.broadcast %98 : vector<32x1xf32> to vector<32x256xf32>
    %100 = arith.addf %96, %99 : vector<32x256xf32>
    %101 = math.tanh %100 : vector<32x256xf32>
    %c3_70 = arith.constant 3 : index
    %c0_71 = arith.constant 0 : index
    %c0_72 = arith.constant 0 : index
    %102 = vector.load %arg4[%c3_70, %c0_71, %c0_72] : memref<4x16x32xf32, #tpu.memory_space<vmem>>, vector<1x16x32xf32>
    %103 = vector.shape_cast %102 : vector<1x16x32xf32> to vector<16x32xf32>
    %cst_73 = arith.constant dense<0.000000e+00> : vector<16x256xf32>
    %104 = tpu.matmul %103, %101, %cst_73 {dimension_numbers = #tpu.dot_dimension_numbers<[1], [0], [0], [1], [0, 0, 1, 1], [], []>} : vector<16x32xf32>, vector<32x256xf32>, vector<16x256xf32> -> vector<16x256xf32>
    %c3_74 = arith.constant 3 : index
    %c0_75 = arith.constant 0 : index
    %c0_76 = arith.constant 0 : index
    %105 = vector.load %arg5[%c3_74, %c0_75, %c0_76] : memref<4x16x1xf32, #tpu.memory_space<vmem>>, vector<1x16x1xf32>
    %106 = vector.shape_cast %105 : vector<1x16x1xf32> to vector<16x1xf32>
    %107 = vector.broadcast %106 : vector<16x1xf32> to vector<16x256xf32>
    %108 = arith.addf %104, %107 : vector<16x256xf32>
    %109 = vector.extract_strided_slice %108 {offsets = [0, 0], sizes = [8, 256], strides = [1, 1]} : vector<16x256xf32> to vector<8x256xf32>
    %110 = vector.extract_strided_slice %108 {offsets = [8, 0], sizes = [8, 256], strides = [1, 1]} : vector<16x256xf32> to vector<8x256xf32>
    %111 = math.exp %109 : vector<8x256xf32>
    %112 = arith.mulf %55, %111 : vector<8x256xf32>
    %113 = arith.addf %112, %110 : vector<8x256xf32>
    %cst_77 = arith.constant dense<0.000000e+00> : vector<256xf32>
    %114 = vector.multi_reduction <add>, %109, %cst_77 [0] : vector<8x256xf32> to vector<256xf32>
    %115 = vector.shape_cast %114 : vector<256xf32> to vector<1x256xf32>
    %116 = arith.addf %87, %115 : vector<1x256xf32>
    %c4 = arith.constant 4 : index
    %c0_78 = arith.constant 0 : index
    %c0_79 = arith.constant 0 : index
    %117 = vector.load %arg6[%c4, %c0_78, %c0_79] : memref<5x16x256xf32, #tpu.memory_space<vmem>>, vector<1x8x256xf32>
    %118 = vector.shape_cast %117 : vector<1x8x256xf32> to vector<8x256xf32>
    %119 = vector.shape_cast %113 : vector<8x256xf32> to vector<1x8x256xf32>
    tpu.vector_store %arg6[%c4, %c0_78, %c0_79], %119 {strides = array<i32>} : memref<5x16x256xf32, #tpu.memory_space<vmem>>, vector<1x8x256xf32>,
    %c4_80 = arith.constant 4 : index
    %c8_81 = arith.constant 8 : index
    %c0_82 = arith.constant 0 : index
    %120 = vector.load %arg6[%c4_80, %c8_81, %c0_82] : memref<5x16x256xf32, #tpu.memory_space<vmem>>, vector<1x8x256xf32>
    %121 = vector.shape_cast %120 : vector<1x8x256xf32> to vector<8x256xf32>
    %122 = vector.shape_cast %84 : vector<8x256xf32> to vector<1x8x256xf32>
    tpu.vector_store %arg6[%c4_80, %c8_81, %c0_82], %122 {strides = array<i32>} : memref<5x16x256xf32, #tpu.memory_space<vmem>>, vector<1x8x256xf32>,
    %123 = arith.mulf %113, %113 : vector<8x256xf32>
    %124 = arith.mulf %84, %84 : vector<8x256xf32>
    %125 = arith.addf %123, %124 : vector<8x256xf32>
    %cst_83 = arith.constant dense<0.000000e+00> : vector<256xf32>
    %126 = vector.multi_reduction <add>, %125, %cst_83 [0] : vector<8x256xf32> to vector<256xf32>
    %127 = vector.shape_cast %126 : vector<256xf32> to vector<1x256xf32>
    %cst_84 = arith.constant -5.000000e-01 : f32
    %128 = vector.broadcast %cst_84 : f32 to vector<1x256xf32>
    %129 = arith.mulf %128, %127 : vector<1x256xf32>
    %cst_85 = arith.constant 14.7030163 : f32
    %130 = vector.broadcast %cst_85 : f32 to vector<1x256xf32>
    %131 = arith.subf %129, %130 : vector<1x256xf32>
    %c0_86 = arith.constant 0 : index
    %c0_87 = arith.constant 0 : index
    %132 = vector.load %arg7[%c0_86, %c0_87] : memref<2x256xf32, #tpu.memory_space<vmem>>, vector<1x256xf32>
    tpu.vector_store %arg7[%c0_86, %c0_87], %131 {strides = array<i32>} : memref<2x256xf32, #tpu.memory_space<vmem>>, vector<1x256xf32>,
    %c1_88 = arith.constant 1 : index
    %c0_89 = arith.constant 0 : index
    %133 = vector.load %arg7[%c1_88, %c0_89] : memref<2x256xf32, #tpu.memory_space<vmem>>, vector<1x256xf32>
    tpu.vector_store %arg7[%c1_88, %c0_89], %116 {strides = array<i32>} : memref<2x256xf32, #tpu.memory_space<vmem>>, vector<1x256xf32>,
    return
  }
  func.func @transform_0(%arg0: i32) -> (i32, i32) {
    %c0_i32 = arith.constant 0 : i32
    %c0_i32_0 = arith.constant 0 : i32
    return %c0_i32, %arg0 : i32, i32
  }
  func.func @transform_1(%arg0: i32) -> (i32, i32, i32) {
    %c0_i32 = arith.constant 0 : i32
    %c0_i32_0 = arith.constant 0 : i32
    %c0_i32_1 = arith.constant 0 : i32
    %c0_i32_2 = arith.constant 0 : i32
    return %c0_i32, %c0_i32_0, %c0_i32_1 : i32, i32, i32
  }
  func.func @transform_2(%arg0: i32) -> (i32, i32, i32) {
    %c0_i32 = arith.constant 0 : i32
    %c0_i32_0 = arith.constant 0 : i32
    %c0_i32_1 = arith.constant 0 : i32
    %c0_i32_2 = arith.constant 0 : i32
    return %c0_i32, %c0_i32_0, %c0_i32_1 : i32, i32, i32
  }
  func.func @transform_3(%arg0: i32) -> (i32, i32, i32) {
    %c0_i32 = arith.constant 0 : i32
    %c0_i32_0 = arith.constant 0 : i32
    %c0_i32_1 = arith.constant 0 : i32
    %c0_i32_2 = arith.constant 0 : i32
    return %c0_i32, %c0_i32_0, %c0_i32_1 : i32, i32, i32
  }
  func.func @transform_4(%arg0: i32) -> (i32, i32, i32) {
    %c0_i32 = arith.constant 0 : i32
    %c0_i32_0 = arith.constant 0 : i32
    %c0_i32_1 = arith.constant 0 : i32
    %c0_i32_2 = arith.constant 0 : i32
    return %c0_i32, %c0_i32_0, %c0_i32_1 : i32, i32, i32
  }
  func.func @transform_5(%arg0: i32) -> (i32, i32, i32) {
    %c0_i32 = arith.constant 0 : i32
    %c0_i32_0 = arith.constant 0 : i32
    %c0_i32_1 = arith.constant 0 : i32
    return %c0_i32, %c0_i32_0, %arg0 : i32, i32, i32
  }
  func.func @transform_6(%arg0: i32) -> (i32, i32) {
    %c0_i32 = arith.constant 0 : i32
    %c0_i32_0 = arith.constant 0 : i32
    return %c0_i32, %arg0 : i32, i32
  }
}

</mosaic_0001>

<bundles_post_ra>
// kernel: tpu_custom_call.1
= control target key start
LH: loop header
LB: loop body
LE: loop exit
PB: predicated region body
PF: predicated region fallthrough
CT: control target
= control target key end

     0   :  { %12 = vsyncpa [#allocation4], 0  ;;  %s2405_s0 = inlined_call_operand.vmem [shape: f32[16,1024], index: 0, kind: input, shape index: {}]   ;;  %s2406_s1 = inlined_call_operand.vmem [shape: f32[4,32,8], index: 1, kind: input, shape index: {}]   ;;  %s2407_s2 = inlined_call_operand.vmem [shape: f32[4,32,1], index: 2, kind: input, shape index: {}]   ;;  %s2408_s3 = inlined_call_operand.vmem [shape: f32[4,16,32], index: 3, kind: input, shape index: {}]   ;;  %s2409_s4 = inlined_call_operand.vmem [shape: f32[4,16,1], index: 4, kind: input, shape index: {}]   ;;  %s2410_s5 = inlined_call_operand.hbm [shape: f32[5,16,1024], index: 5, kind: output, shape index: {0}]   ;;  %s2411_s6 = inlined_call_operand.hbm [shape: f32[2,1024], index: 6, kind: output, shape index: {1}]  }
   0x1   :  { %14 = vsyncpa [#allocation4 + $0x1], 0 }
   0x2   :  { %15 = vsyncpa [#allocation6], 0 }
   0x3   :  { %17 = vsyncpa [#allocation6 + $0x1], 0  ;;  %s1956_s21 = smov 0   ;;  %s1958_s22 = smov 0  }
   0x4   :  { %s1960_s23 = smov 0   ;;  %s1962_s24 = smov 0  }
   0x5 LB: > { %s1977_s25 = sadd.s32 4294967295, %s1911_s24   ;;  %s1554_s26 = sadd.s32 4294967294, %s1911_s24   ;;  %s1911_s24 = sphi %s1962_s24, %s2419_s24   ;;  %s1907_s23 = sphi %s1960_s23, %s2418_s23   ;;  %s1903_s22 = sphi %s1958_s22, %s2417_s22   ;;  %s1899_s21 = sphi %s1956_s21, %s2416_s21  }
   0x6   : > { %s1981_s27 = sadd.s32 1, %s1911_s24   ;;  %s30_s28 = sadd.s32 1, %s1907_s23 }
   0x7   : > { %s27_s29 = ssub.s32 %s1911_s24, %s1981_s27  ;;  %p37_p0 = scmp.ne.s32.totalorder %s1907_s23, %s1903_s22 }
   0x8   : > { %p28_p1 = scmp.eq.s32.totalorder %s27_s29, 0  ;;  %p38_p2 = scmp.eq.s32.totalorder %s1911_s24, 0 }
   0x9   : > { %p151_p3 = scmp.eq.s32.totalorder %s1977_s25, 3  ;;  %p156_p4 = scmp.ne.s32.totalorder %s1903_s22, %s1899_s21 }
   0xa   : > { %s1993_s30 = scalar_select %p28_p1, %s1907_s23, %s30_s28  }
   0xb   : > { %p39_p5 = por %p38_p2, %p37_p0  ;;  %p1995_p6 = por %p151_p3, %p37_p0 }
   0xc   : > { %p157_p7 = scmp.eq.s32.totalorder %s1554_s26, 3  ;;  %p1556_p9 = scmp.ge.s32.totalorder %s1911_s24, 4 }
   0xe   : > { %p1999_p8 = por %p157_p7, %p156_p4  ;;  %211 = sbr.rel (%p1556_p9) target bundleno = 28 (0x1c), region = 32 }
  0x15   : > { %214 = sbr.rel (!%p39_p5) target bundleno = 28 (0x1c), region = 36  ;;  %s216_s9 = sand.u32 (%p39_p5), 1, %s1907_s23  }
  0x16   : > { %s1649_s10 = sshll.u32 (%p39_p5), %s1911_s24, 4  ;;  %s1557_s11 = sshll.u32 (%p39_p5), %s216_s9, 5 }
  0x17   : > { %s221_s14 = scalar_lea.vmem (%p39_p5), %s2405_s0, %s1649_s10  ;;  %s218_s15 = scalar_lea.vmem (%p39_p5), [#allocation2], %s1557_s11 }
  0x18   : > { %v234_v0 = vld [vmem:[%s221_s14] sm:$0xff] (%p39_p5)  ;;  %v236_v1 = vld [vmem:[%s221_s14 + $0x8] sm:$0xff] (%p39_p5) }
  0x19   : > { %v238_v2 = vld [vmem:[%s221_s14 + $0x40] sm:$0xff] (%p39_p5)  ;;  %235 = vst [vmem:[%s218_s15] sm:$0xff] (%p39_p5), %v234_v0  ;;  %237 = vst [vmem:[%s218_s15 + $0x8] sm:$0xff] (%p39_p5), %v236_v1  ;;  %v240_v3 = vld [vmem:[%s221_s14 + $0x48] sm:$0xff] (%p39_p5) }
  0x1a   : > { %239 = vst [vmem:[%s218_s15 + $0x10] sm:$0xff] (%p39_p5), %v238_v2  ;;  %241 = vst [vmem:[%s218_s15 + $0x18] sm:$0xff] (%p39_p5), %v240_v3 }
  0x1c PF: > { %p1560_p10 = scmp.ge.s32.totalorder %s1911_s24, 1  ;;  %p246_p11 = scmp.lt.s32.totalorder %s1911_s24, 5 }
  0x1e   : > { %p247_p12 = pnand %p1560_p10, %p246_p11 }
  0x1f   : > { %s2012_s16 = sand.u32 (!%p247_p12), 1, %s1903_s22   ;;  %v1913_v4 = vmov (!%p247_p12), 0.0   ;;  %v302_v5 = vld [vmem:[%s2407_s2] sm:$0xff] (!%p247_p12)  ;;  %v304_v6 = vld [vmem:[%s2407_s2 + $0x10] sm:$0xff] (!%p247_p12)  ;;  %v1914_v7 = vmov (!%p247_p12), 0   ;;  %vm326_vm0 = vcmask (!%p247_p12), 64512  }
  0x20   : > { %250 = sbr.rel (%p247_p12) target bundleno = 1999 (0x7cf), region = 59  ;;  %s1561_s17 = sshll.u32 (!%p247_p12), %s2012_s16, 5  ;;  %403 = vmatprep.mubr.f32.mxu0 (!%p247_p12), %v1913_v4  ;;  %521 = vmatprep.mubr.f32.mxu1 (!%p247_p12), %v1913_v4  ;;  %v298_v10 = vld [vmem:[%s2406_s1] sm:$0xff] (!%p247_p12)  ;;  %v303_v11 = vld [vmem:[%s2407_s2 + $0x8] sm:$0xff] (!%p247_p12)  ;;  %v305_v12 = vld [vmem:[%s2407_s2 + $0x18] sm:$0xff] (!%p247_p12)  ;;  %vm450_vm1 = vcmask (!%p247_p12), 261120  }
  0x21   : > { %s1684_s18 = smul.u32 (!%p247_p12), 160, %s2012_s16  ;;  %1735 = vset.pattern.permute.xlu0 (!%p247_p12), %v1914_v7  ;;  %1736 = vset.pattern.permute.xlu1 (!%p247_p12), %v1914_v7  ;;  %s2024_s29 = scalar_lea.vmem (!%p247_p12), [#allocation2], %s1561_s17  ;;  %v299_v13 = vld [vmem:[%s2406_s1 + $0x8] sm:$0xff] (!%p247_p12)  ;;  %v438_v14 = vld [vmem:[%s2409_s4] sm:$0xff] (!%p247_p12)  ;;  %v300_v16 = vld [vmem:[%s2406_s1 + $0x10] sm:$0xff] (!%p247_p12) }
  0x22   : > { %v2027_v8 = vld [vmem:[%s2024_s29 + $0x8] sm:$0xff] (!%p247_p12)  ;;  %v2030_v9 = vld [vmem:[%s2024_s29] sm:$0xff] (!%p247_p12)  ;;  %308 = vperm.xlu0 (!%p247_p12), %1735, %v302_v5   ;;  %318 = vperm.xlu1 (!%p247_p12), %1736, %v304_v6   ;;  %v301_v19 = vld [vmem:[%s2406_s1 + $0x18] sm:$0xff] (!%p247_p12)  ;;  %s1650_s15 = sshll.u32 (!%p247_p12), %s1977_s25, 8  ;;  %s1562_s20 = sshll.u32 (!%p247_p12), %s2012_s16, 2 }
  0x23   : > { %s2035_s11 = scalar_lea.vmem (!%p247_p12), [#allocation3], %s1684_s18  ;;  %339 = vmatprep.subr.mxu0 (!%p247_p12), %v2027_v8  ;;  %v439_v15 = vld [vmem:[%s2409_s4 + $0x8] sm:$0xff] (!%p247_p12)  ;;  %v1577_v17 = vld [vmem:[%s2407_s2 + $0x20] sm:$0xff] (!%p247_p12)  ;;  %v1579_v20 = vld [vmem:[%s2407_s2 + $0x30] sm:$0xff] (!%p247_p12)  ;;  %s2309_s19 = scalar_lea.hbm (!%p247_p12), %s2410_s5, %s1650_s15 }
  0x24   : > { %295 = vst [vmem:[%s2035_s11 + $0x8] sm:$0xff] (!%p247_p12), %v2027_v8  ;;  %1570 = vst [vmem:[%s2035_s11 + $0x28] sm:$0xff] (!%p247_p12), %v2027_v8  ;;  %340 = vmatpush1.msra.mxu0 (!%p247_p12), %v2030_v9  ;;  %v1578_v18 = vld [vmem:[%s2407_s2 + $0x28] sm:$0xff] (!%p247_p12)  ;;  %v1580_v21 = vld [vmem:[%s2407_s2 + $0x38] sm:$0xff] (!%p247_p12)  ;;  %s1440_s17 = sshll.u32 (!%p247_p12), %s2035_s11, 4  ;;  %s1422_s26 = scalar_lea.sflag (!%p247_p12), [#allocation4], %s2012_s16  ;;  %s2312_s17 = int_to_ptr.vmem [resolvable:$true] %s1440_s17 }
  0x25   : > { %294 = vst [vmem:[%s2035_s11] sm:$0xff] (!%p247_p12), %v2030_v9  ;;  %1569 = vst [vmem:[%s2035_s11 + $0x20] sm:$0xff] (!%p247_p12), %v2030_v9  ;;  %1563 = vmatmul.mubr.msk.f32.vlgmr.msra.gmra.mrb[0].mxu0 (!%p247_p12), %vm326_vm0, %v298_v10  ;;  %v1587_v22 = vld [vmem:[%s2409_s4 + $0x10] sm:$0xff] (!%p247_p12)  ;;  %v1588_v23 = vld [vmem:[%s2409_s4 + $0x18] sm:$0xff] (!%p247_p12)  ;;  %s1817_s28 = scalar_lea.vmem (!%p247_p12), %s2312_s17, 2560  ;;  %s1916_s9 = smov (!%p247_p12), [#allocation3]  }
  0x26   : > { %409 = vmatprep.mubr.f32.mxu0 (!%p247_p12), %v1913_v4  ;;  %313 = vperm.xlu0 (!%p247_p12), %1735, %v303_v11   ;;  %v1599_v24 = vld [vmem:[%s2407_s2 + $0x40] sm:$0xff] (!%p247_p12)  ;;  %v1600_v25 = vld [vmem:[%s2407_s2 + $0x48] sm:$0xff] (!%p247_p12)  ;;  %v1601_v26 = vld [vmem:[%s2407_s2 + $0x50] sm:$0xff] (!%p247_p12)  ;;  %p1818_p13 = scmp.ne.s32.totalorder (!%p247_p12), %s2312_s17, %s1817_s28  ;;  %s1821_s10 = sshll.u32 (!%p247_p12), %s1916_s9, 4  ;;  %s1822_s10 = int_to_ptr.vmem [resolvable:$false] %s1821_s10 }
  0x27   : > { %323 = vperm.xlu1 %1736, %v305_v12   ;;  %v1602_v27 = vld [vmem:[%s2407_s2 + $0x58] sm:$0xff]  ;;  %v1609_v28 = vld [vmem:[%s2409_s4 + $0x20] sm:$0xff]  ;;  %v1610_v29 = vld [vmem:[%s2409_s4 + $0x28] sm:$0xff]  ;;  %s1823_s12 = scalar_lea.vmem %s1822_s10, 5120  ;;  %p1824_p2 = scmp.lt.s32.totalorder %s2312_s17, %s1822_s10 }
  0x28   : > { %v1621_v30 = vld [vmem:[%s2407_s2 + $0x60] sm:$0xff]  ;;  %v1622_v31 = vld [vmem:[%s2407_s2 + $0x68] sm:$0xff]  ;;  %v1623_v32 = vld [vmem:[%s2407_s2 + $0x70] sm:$0xff]  ;;  %p1819_p0 = pnand %p1818_p13, %p1995_p6  ;;  %p1825_p3 = scmp.lt.s32.totalorder %s1823_s12, %s1817_s28 }
  0x29   : > { %1564 = vmatmul.mubr.msk.f32.gmra.mrb[2].mxu0 %vm326_vm0, %v299_v13  ;;  %v1624_v33 = vld [vmem:[%s2407_s2 + $0x78] sm:$0xff]  ;;  %v1631_v34 = vld [vmem:[%s2409_s4 + $0x30] sm:$0xff]  ;;  %v436_v5 = vld [vmem:[%s2408_s3] sm:$0xff] }
  0x2a   : > { %415 = vmatprep.mubr.f32.mxu0 %v1913_v4  ;;  %442 = vperm.xlu0 %1735, %v438_v14   ;;  %v1632_v35 = vld [vmem:[%s2409_s4 + $0x38] sm:$0xff]  ;;  %v437_v6 = vld [vmem:[%s2408_s3 + $0x8] sm:$0xff]  ;;  %v292_v7 = vld [vmem:[%s2024_s29 + $0x10] sm:$0xff]  ;;  %p1820_p1 = pneg %p1819_p0  ;;  %p1826_p4 = por %p1825_p3, %p1824_p2 }
  0x2b   : > { %447 = vperm.xlu1 %1736, %v439_v15   ;;  %296 = vst [vmem:[%s2035_s11 + $0x10] sm:$0xff] %v292_v7  ;;  %v293_v10 = vld [vmem:[%s2024_s29 + $0x18] sm:$0xff] }
  0x2c   : > { %297 = vst [vmem:[%s2035_s11 + $0x18] sm:$0xff] %v293_v10  ;;  %p1827_p5 = pnand %p1826_p4, %p1820_p1 }
  0x2d   : > { %1565 = vmatmul.mubr.msk.f32.gmra.mrb[4].mxu0 %vm326_vm0, %v300_v16 }
  0x2e   : > { %421 = vmatprep.mubr.f32.mxu0 %v1913_v4  ;;  %573 = vperm.xlu0 %1735, %v1577_v17  }
  0x2f   : > { %578 = vperm.xlu1 %1736, %v1578_v18  }
  0x31   : > { %1566 = vmatmul.mubr.msk.f32.gmra.mrb[6].mxu0 %vm326_vm0, %v301_v19 }
  0x32   : > { %583 = vperm.xlu0 %1735, %v1579_v20   ;;  %786 = vmatprep.mubr.f32.mxu0 %v1913_v4 }
  0x33   : > { %588 = vperm.xlu1 %1736, %v1580_v21  }
  0x36   : > { %708 = vperm.xlu0 %1735, %v1587_v22  }
  0x37   : > { %713 = vperm.xlu1 %1736, %v1588_v23  }
  0x3a   : > { %838 = vperm.xlu0 %1735, %v1599_v24  }
  0x3b   : > { %843 = vperm.xlu1 %1736, %v1600_v25  }
  0x3e   : > { %848 = vperm.xlu0 %1735, %v1601_v26  }
  0x3f   : > { %853 = vperm.xlu1 %1736, %v1602_v27  }
  0x42   : > { %973 = vperm.xlu0 %1735, %v1609_v28  }
  0x43   : > { %978 = vperm.xlu1 %1736, %v1610_v29   ;;  %v1573_v29 = vld [vmem:[%s2406_s1 + $0x20] sm:$0xff] }
  0x46   : > { %1103 = vperm.xlu0 %1735, %v1621_v30   ;;  %v1574_v30 = vld [vmem:[%s2406_s1 + $0x28] sm:$0xff] }
  0x47   : > { %1108 = vperm.xlu1 %1736, %v1622_v31   ;;  %v1575_v31 = vld [vmem:[%s2406_s1 + $0x30] sm:$0xff] }
  0x4a   : > { %1113 = vperm.xlu0 %1735, %v1623_v32   ;;  %v1576_v32 = vld [vmem:[%s2406_s1 + $0x38] sm:$0xff] }
  0x4b   : > { %1118 = vperm.xlu1 %1736, %v1624_v33  }
  0x4e   : > { %1238 = vperm.xlu0 %1735, %v1631_v34  }
  0x4f   : > { %1243 = vperm.xlu1 %1736, %v1632_v35  }
  0xa1   : > { %v309_v36 = vpop.permute.xlu0 %308  ;;  %v319_v45 = vpop.permute.xlu1 %318 }
  0xa5   : > { %v314_v41 = vpop.permute.xlu0 %313 }
  0xa6   : > { %v324_v51 = vpop.permute.xlu1 %323 }
  0xa9   : > { %v443_v11 = vpop.permute.xlu0 %442 }
  0xaa   : > { %v448_v21 = vpop.permute.xlu1 %447 }
  0xad   : > { %v574_v33 = vpop.permute.xlu0 %573 }
  0xf8   : > { %v405_v37 = vpop.f32.mrb[0].mxu0 }
  0xf9   : > { %v406_v38 = vadd.f32 %v405_v37, %v309_v36  ;;  %v407_v39 = vpop.f32.mrb[1].mxu0 }
  0xfa   : > { %v408_v40 = vadd.f32 %v407_v39, %v309_v36 }
  0xfb   : > { %1737 = vtanh.f32 %v406_v38  ;;  %v579_v38 = vpop.permute.xlu1 %578 }
  0xfc   : > { %v411_v42 = vpop.f32.mrb[2].mxu0  ;;  %1739 = vtanh.f32 %v408_v40 }
  0xfd   : > { %v412_v43 = vadd.f32 %v411_v42, %v314_v41  ;;  %v413_v44 = vpop.f32.mrb[3].mxu0 }
  0xfe   : > { %v414_v46 = vadd.f32 %v413_v44, %v314_v41 }
  0xff   : > { %1741 = vtanh.f32 %v412_v43  ;;  %v584_v43 = vpop.permute.xlu0 %583 }
 0x100   : > { %1743 = vtanh.f32 %v414_v46  ;;  %v417_v47 = vpop.f32.mrb[4].mxu0 }
 0x101   : > { %v418_v48 = vadd.f32 %v417_v47, %v319_v45  ;;  %v419_v49 = vpop.f32.mrb[5].mxu0 }
 0x102   : > { %v420_v50 = vadd.f32 %v419_v49, %v319_v45 }
 0x103   : > { %1745 = vtanh.f32 %v418_v48  ;;  %v589_v48 = vpop.permute.xlu1 %588 }
 0x104   : > { %v423_v52 = vpop.f32.mrb[6].mxu0  ;;  %1747 = vtanh.f32 %v420_v50 }
 0x105   : > { %v424_v53 = vadd.f32 %v423_v52, %v324_v51  ;;  %v425_v54 = vpop.f32.mrb[7].mxu0  ;;  %v1738_v56 = vpop.eup %1737 }
 0x106   : > { %v426_v55 = vadd.f32 %v425_v54, %v324_v51  ;;  %v1740_v57 = vpop.eup %1739 }
 0x107   : > { %1749 = vtanh.f32 %v424_v53 }
 0x108   : > { %1751 = vtanh.f32 %v426_v55 }
 0x109   : > { %v1742_v58 = vpop.eup %1741 }
 0x10a   : > { %v1744_v59 = vpop.eup %1743  ;;  %v1654_v60 = vpack.c.bf16 %v1742_v58, %v1738_v56 }
 0x10b   : > { %v1652_v61 = vpack.c.bf16 %v1744_v59, %v1740_v57 }
 0x10d   : > { %1653 = vmatprep.subr.bf16.mxu1 %v1652_v61  ;;  %v1746_v62 = vpop.eup %1745 }
 0x10e   : > { %1655 = vmatpush1.bf16.msra.mxu1 %v1654_v60  ;;  %v1748_v63 = vpop.eup %1747 }
 0x111   : > { %v1750_v0 = vpop.eup %1749 }
 0x112   : > { %v1752_v1 = vpop.eup %1751  ;;  %v1658_v2 = vpack.c.bf16 %v1750_v0, %v1746_v62 }
 0x113   : > { %v1656_v3 = vpack.c.bf16 %v1752_v1, %v1748_v63  ;;  %v1585_v1 = vld [vmem:[%s2408_s3 + $0x10] sm:$0xff] }
 0x115   : > { %1657 = vmatprep.subr.bf16.mxu1 %v1656_v3 }
 0x116   : > { %1659 = vmatpush1.bf16.msra.mxu1 %v1658_v2  ;;  %v1586_v2 = vld [vmem:[%s2408_s3 + $0x18] sm:$0xff] }
 0x119   : > { %1567 = vmatmul.mubr.msk.f32.vlgmr.msra.gmra.mrb[0].mxu1 %vm450_vm1, %v436_v5 }
 0x11a   : > { %527 = vmatprep.mubr.f32.mxu1 %v1913_v4 }
 0x11d   : > { %1568 = vmatmul.mubr.msk.f32.gmra.mrb[2].mxu1 %vm450_vm1, %v437_v6 }
 0x11e   : > { %667 = vmatprep.mubr.f32.mxu1 %v1913_v4 }
 0x1ec   : > { %v523_v12 = vpop.f32.mrb[0].mxu1 }
 0x1ed   : > { %v2144_v13 = vadd.f32 %v523_v12, %v443_v11  ;;  %v525_v14 = vpop.f32.mrb[1].mxu1 }
 0x1ee   : > { %v2146_v15 = vadd.f32 %v525_v14, %v443_v11 }
 0x1ef   : > { %v534_v16 = vmul.f32 1.442695, %v2144_v13  ;;  %v542_v3 = vrot.slane %v2144_v13, 4 }
 0x1f0   : > { %v536_v17 = vmul.f32 1.442695, %v2146_v15  ;;  %v529_v18 = vpop.f32.mrb[2].mxu1  ;;  %v548_v5 = vrot.slane %v2146_v15, 4 }
 0x1f1   : > { %1753 = vpow2.f32 %v534_v16  ;;  %v531_v19 = vpop.f32.mrb[3].mxu1  ;;  %v530_v23 = vadd.f32 %v529_v18, %v448_v21  ;;  %v543_v6 = vadd.f32 %v542_v3, %v2144_v13 }
 0x1f2   : > { %1755 = vpow2.f32 %v536_v17  ;;  %v532_v25 = vadd.f32 %v531_v19, %v448_v21 }
 0x1f3   : > { %v544_v12 = vrot.slane %v543_v6, 2 }
 0x1fb   : > { %v1754_v20 = vpop.eup %1753 }
 0x1fc   : > { %v1756_v22 = vpop.eup %1755  ;;  %v538_v24 = vmul.f32 %v1754_v20, %v292_v7  ;;  %v549_v7 = vadd.f32 %v548_v5, %v2146_v15 }
 0x1fd   : > { %v539_v26 = vmul.f32 %v1756_v22, %v293_v10  ;;  %v709_v10 = vpop.permute.xlu0 %708 }
 0x1fe   : > { %v2150_v27 = vadd.f32 %v538_v24, %v530_v23  ;;  %v550_v17 = vrot.slane %v549_v7, 2  ;;  %v545_v24 = vadd.f32 %v544_v12, %v543_v6 }
 0x1ff   : > { %v2152_v28 = vadd.f32 %v539_v26, %v532_v25 }
 0x200   : > { %1571 = vst [vmem:[%s2035_s11 + $0x30] sm:$0xff] %v2150_v27  ;;  %1593 = vst [vmem:[%s2035_s11 + $0x50] sm:$0xff] %v2150_v27 }
 0x201   : > { %1572 = vst [vmem:[%s2035_s11 + $0x38] sm:$0xff] %v2152_v28  ;;  %1594 = vst [vmem:[%s2035_s11 + $0x58] sm:$0xff] %v2152_v28  ;;  %603 = vmatprep.subr.mxu1 %v2152_v28 }
 0x202   : > { %604 = vmatpush1.msra.mxu1 %v2150_v27 }
 0x203   : > { %1581 = vmatmul.mubr.msk.f32.vlgmr.msra.gmra.mrb[4].mxu1 %vm326_vm0, %v1573_v29  ;;  %v551_v29 = vadd.f32 %v550_v17, %v549_v7 }
 0x204   : > { %673 = vmatprep.mubr.f32.mxu1 %v1913_v4 }
 0x207   : > { %1582 = vmatmul.mubr.msk.f32.gmra.mrb[6].mxu1 %vm326_vm0, %v1574_v30 }
 0x208   : > { %679 = vmatprep.mubr.f32.mxu1 %v1913_v4 }
 0x20b   : > { %1583 = vmatmul.mubr.msk.f32.gmra.mrb[8].mxu1 %vm326_vm0, %v1575_v31  ;;  %v546_v31 = vrot.slane %v545_v24, 1 }
 0x20c   : > { %685 = vmatprep.mubr.f32.mxu1 %v1913_v4 }
 0x20f   : > { %1584 = vmatmul.mubr.msk.f32.gmra.mrb[10].mxu1 %vm326_vm0, %v1576_v32 }
 0x210   : > { %1051 = vmatprep.mubr.f32.mxu1 %v1913_v4 }
 0x2d6   : > { %v669_v34 = vpop.f32.mrb[4].mxu1 }
 0x2d7   : > { %v670_v35 = vadd.f32 %v669_v34, %v574_v33  ;;  %v671_v36 = vpop.f32.mrb[5].mxu1 }
 0x2d8   : > { %v672_v37 = vadd.f32 %v671_v36, %v574_v33  ;;  %v552_v33 = vrot.slane %v551_v29, 1 }
 0x2d9   : > { %1757 = vtanh.f32 %v670_v35 }
 0x2da   : > { %v675_v39 = vpop.f32.mrb[6].mxu1  ;;  %1759 = vtanh.f32 %v672_v37  ;;  %v547_v37 = vadd.f32 %v546_v31, %v545_v24 }
 0x2db   : > { %v676_v40 = vadd.f32 %v675_v39, %v579_v38  ;;  %v677_v41 = vpop.f32.mrb[7].mxu1  ;;  %v553_v39 = vadd.f32 %v552_v33, %v551_v29  ;;  %v1607_v29 = vld [vmem:[%s2408_s3 + $0x20] sm:$0xff] }
 0x2dc   : > { %v678_v42 = vadd.f32 %v677_v41, %v579_v38 }
 0x2dd   : > { %1761 = vtanh.f32 %v676_v40 }
 0x2de   : > { %1763 = vtanh.f32 %v678_v42  ;;  %v681_v44 = vpop.f32.mrb[8].mxu1  ;;  %v714_v42 = vpop.permute.xlu1 %713 }
 0x2df   : > { %v682_v45 = vadd.f32 %v681_v44, %v584_v43  ;;  %v683_v46 = vpop.f32.mrb[9].mxu1 }
 0x2e0   : > { %v684_v47 = vadd.f32 %v683_v46, %v584_v43 }
 0x2e1   : > { %1765 = vtanh.f32 %v682_v45 }
 0x2e2   : > { %v687_v49 = vpop.f32.mrb[10].mxu1  ;;  %1767 = vtanh.f32 %v684_v47 }
 0x2e3   : > { %v688_v50 = vadd.f32 %v687_v49, %v589_v48  ;;  %v689_v51 = vpop.f32.mrb[11].mxu1  ;;  %v1758_v53 = vpop.eup %1757 }
 0x2e4   : > { %v690_v52 = vadd.f32 %v689_v51, %v589_v48  ;;  %v1760_v54 = vpop.eup %1759 }
 0x2e5   : > { %1769 = vtanh.f32 %v688_v50 }
 0x2e6   : > { %1771 = vtanh.f32 %v690_v52  ;;  %v1595_v52 = vld [vmem:[%s2406_s1 + $0x40] sm:$0xff] }
 0x2e7   : > { %v1762_v55 = vpop.eup %1761 }
 0x2e8   : > { %v1764_v56 = vpop.eup %1763  ;;  %v1662_v57 = vpack.c.bf16 %v1762_v55, %v1758_v53  ;;  %v1598_v53 = vld [vmem:[%s2406_s1 + $0x58] sm:$0xff] }
 0x2e9   : > { %v1660_v58 = vpack.c.bf16 %v1764_v56, %v1760_v54  ;;  %v839_v54 = vpop.permute.xlu0 %838 }
 0x2eb   : > { %1661 = vmatprep.subr.bf16.mxu0 %v1660_v58  ;;  %v1766_v59 = vpop.eup %1765 }
 0x2ec   : > { %1663 = vmatpush1.bf16.msra.mxu0 %v1662_v57  ;;  %v1768_v60 = vpop.eup %1767 }
 0x2ef   : > { %v1770_v61 = vpop.eup %1769 }
 0x2f0   : > { %v1772_v62 = vpop.eup %1771  ;;  %v1666_v63 = vpack.c.bf16 %v1770_v61, %v1766_v59  ;;  %v844_v59 = vpop.permute.xlu1 %843 }
 0x2f1   : > { %v1664_v0 = vpack.c.bf16 %v1772_v62, %v1768_v60 }
 0x2f3   : > { %1665 = vmatprep.subr.bf16.mxu0 %v1664_v0  ;;  %v849_v0 = vpop.permute.xlu0 %848 }
 0x2f4   : > { %1667 = vmatpush1.bf16.msra.mxu0 %v1666_v63  ;;  %v854_v6 = vpop.permute.xlu1 %853 }
 0x2f7   : > { %1589 = vmatmul.mubr.msk.f32.vlgmr.msra.gmra.mrb[8].mxu0 %vm450_vm1, %v1585_v1 }
 0x2f8   : > { %792 = vmatprep.mubr.f32.mxu0 %v1913_v4 }
 0x2fb   : > { %1590 = vmatmul.mubr.msk.f32.gmra.mrb[10].mxu0 %vm450_vm1, %v1586_v2 }
 0x2fc   : > { %932 = vmatprep.mubr.f32.mxu0 %v1913_v4 }
 0x3ca   : > { %v788_v11 = vpop.f32.mrb[8].mxu0 }
 0x3cb   : > { %v789_v14 = vadd.f32 %v788_v11, %v709_v10  ;;  %v790_v16 = vpop.f32.mrb[9].mxu0 }
 0x3cc   : > { %v791_v18 = vadd.f32 %v790_v16, %v709_v10 }
 0x3cd   : > { %v799_v19 = vmul.f32 1.442695, %v789_v14  ;;  %v807_v20 = vrot.slane %v789_v14, 4 }
 0x3ce   : > { %v801_v21 = vmul.f32 1.442695, %v791_v18  ;;  %v813_v22 = vrot.slane %v791_v18, 4  ;;  %v794_v23 = vpop.f32.mrb[10].mxu0 }
 0x3cf   : > { %1773 = vpow2.f32 %v799_v19  ;;  %v808_v25 = vadd.f32 %v807_v20, %v789_v14  ;;  %v796_v26 = vpop.f32.mrb[11].mxu0  ;;  %v795_v46 = vadd.f32 %v794_v23, %v714_v42 }
 0x3d0   : > { %1775 = vpow2.f32 %v801_v21  ;;  %v814_v13 = vadd.f32 %v813_v22, %v791_v18  ;;  %v797_v48 = vadd.f32 %v796_v26, %v714_v42 }
 0x3d1   : > { %v809_v15 = vrot.slane %v808_v25, 2 }
 0x3d2   : > { %v815_v30 = vrot.slane %v814_v13, 2 }
 0x3d3   : > { %v810_v32 = vadd.f32 %v809_v15, %v808_v25  ;;  %v974_v15 = vpop.permute.xlu0 %973 }
 0x3d4   : > { %v816_v34 = vadd.f32 %v815_v30, %v814_v13  ;;  %v1608_v13 = vld [vmem:[%s2408_s3 + $0x28] sm:$0xff] }
 0x3d5   : > { %v811_v35 = vrot.slane %v810_v32, 1 }
 0x3d6   : > { %v817_v36 = vrot.slane %v816_v34, 1 }
 0x3d7   : > { %v812_v38 = vadd.f32 %v811_v35, %v810_v32 }
 0x3d8   : > { %v818_v40 = vadd.f32 %v817_v36, %v816_v34 }
 0x3d9   : > { %v1774_v41 = vpop.eup %1773  ;;  %v2198_v43 = vadd.f32 %v812_v38, %v547_v37 }
 0x3da   : > { %v1776_v44 = vpop.eup %1775  ;;  %v2200_v45 = vadd.f32 %v818_v40, %v553_v39  ;;  %v803_v47 = vmul.f32 %v1774_v41, %v2030_v9  ;;  %v1597_v9 = vld [vmem:[%s2406_s1 + $0x50] sm:$0xff] }
 0x3db   : > { %v804_v49 = vmul.f32 %v1776_v44, %v2027_v8  ;;  %v1596_v8 = vld [vmem:[%s2406_s1 + $0x48] sm:$0xff] }
 0x3dc   : > { %v2204_v50 = vadd.f32 %v803_v47, %v795_v46 }
 0x3dd   : > { %v2206_v51 = vadd.f32 %v804_v49, %v797_v48 }
 0x3de   : > { %1591 = vst [vmem:[%s2035_s11 + $0x40] sm:$0xff] %v2204_v50  ;;  %1613 = vst [vmem:[%s2035_s11 + $0x60] sm:$0xff] %v2204_v50 }
 0x3df   : > { %1592 = vst [vmem:[%s2035_s11 + $0x48] sm:$0xff] %v2206_v51  ;;  %1614 = vst [vmem:[%s2035_s11 + $0x68] sm:$0xff] %v2206_v51  ;;  %868 = vmatprep.subr.mxu0 %v2206_v51 }
 0x3e0   : > { %869 = vmatpush1.msra.mxu0 %v2204_v50 }
 0x3e1   : > { %1603 = vmatmul.mubr.msk.f32.vlgmr.msra.gmra.mrb[12].mxu0 %vm326_vm0, %v1595_v52 }
 0x3e2   : > { %938 = vmatprep.mubr.f32.mxu0 %v1913_v4 }
 0x3e5   : > { %1604 = vmatmul.mubr.msk.f32.gmra.mrb[14].mxu0 %vm326_vm0, %v1596_v8 }
 0x3e6   : > { %944 = vmatprep.mubr.f32.mxu0 %v1913_v4 }
 0x3e9   : > { %1605 = vmatmul.mubr.msk.f32.gmra.mrb[16].mxu0 %vm326_vm0, %v1597_v9 }
 0x3ea   : > { %950 = vmatprep.mubr.f32.mxu0 %v1913_v4 }
 0x3ed   : > { %1606 = vmatmul.mubr.msk.f32.gmra.mrb[18].mxu0 %vm326_vm0, %v1598_v53  ;;  %v979_v53 = vpop.permute.xlu1 %978 }
 0x3ee   : > { %1316 = vmatprep.mubr.f32.mxu0 %v1913_v4 }
 0x4b4   : > { %v934_v55 = vpop.f32.mrb[12].mxu0 }
 0x4b5   : > { %v935_v56 = vadd.f32 %v934_v55, %v839_v54  ;;  %v936_v57 = vpop.f32.mrb[13].mxu0 }
 0x4b6   : > { %v937_v58 = vadd.f32 %v936_v57, %v839_v54 }
 0x4b7   : > { %1777 = vtanh.f32 %v935_v56 }
 0x4b8   : > { %v940_v60 = vpop.f32.mrb[14].mxu0  ;;  %1779 = vtanh.f32 %v937_v58 }
 0x4b9   : > { %v941_v61 = vadd.f32 %v940_v60, %v844_v59  ;;  %v942_v62 = vpop.f32.mrb[15].mxu0 }
 0x4ba   : > { %v943_v63 = vadd.f32 %v942_v62, %v844_v59 }
 0x4bb   : > { %1781 = vtanh.f32 %v941_v61 }
 0x4bc   : > { %1783 = vtanh.f32 %v943_v63  ;;  %v946_v1 = vpop.f32.mrb[16].mxu0  ;;  %v1104_v63 = vpop.permute.xlu0 %1103 }
 0x4bd   : > { %v947_v2 = vadd.f32 %v946_v1, %v849_v0  ;;  %v948_v3 = vpop.f32.mrb[17].mxu0 }
 0x4be   : > { %v949_v5 = vadd.f32 %v948_v3, %v849_v0 }
 0x4bf   : > { %1785 = vtanh.f32 %v947_v2 }
 0x4c0   : > { %v952_v7 = vpop.f32.mrb[18].mxu0  ;;  %1787 = vtanh.f32 %v949_v5  ;;  %v1109_v5 = vpop.permute.xlu1 %1108 }
 0x4c1   : > { %v953_v10 = vadd.f32 %v952_v7, %v854_v6  ;;  %v954_v11 = vpop.f32.mrb[19].mxu0  ;;  %v1778_v14 = vpop.eup %1777 }
 0x4c2   : > { %v955_v12 = vadd.f32 %v954_v11, %v854_v6  ;;  %v1780_v16 = vpop.eup %1779 }
 0x4c3   : > { %1789 = vtanh.f32 %v953_v10 }
 0x4c4   : > { %1791 = vtanh.f32 %v955_v12  ;;  %v1114_v12 = vpop.permute.xlu0 %1113 }
 0x4c5   : > { %v1782_v17 = vpop.eup %1781 }
 0x4c6   : > { %v1784_v18 = vpop.eup %1783  ;;  %v1670_v19 = vpack.c.bf16 %v1782_v17, %v1778_v14 }
 0x4c7   : > { %v1668_v20 = vpack.c.bf16 %v1784_v18, %v1780_v16 }
 0x4c9   : > { %1669 = vmatprep.subr.bf16.mxu1 %v1668_v20  ;;  %v1786_v21 = vpop.eup %1785 }
 0x4ca   : > { %1671 = vmatpush1.bf16.msra.mxu1 %v1670_v19  ;;  %v1788_v22 = vpop.eup %1787  ;;  %v1119_v19 = vpop.permute.xlu1 %1118 }
 0x4cd   : > { %v1790_v23 = vpop.eup %1789 }
 0x4ce   : > { %v1792_v24 = vpop.eup %1791  ;;  %v1674_v25 = vpack.c.bf16 %v1790_v23, %v1786_v21 }
 0x4cf   : > { %v1672_v26 = vpack.c.bf16 %v1792_v24, %v1788_v22 }
 0x4d1   : > { %1673 = vmatprep.subr.bf16.mxu1 %v1672_v26 }
 0x4d2   : > { %1675 = vmatpush1.bf16.msra.mxu1 %v1674_v25 }
 0x4d5   : > { %1611 = vmatmul.mubr.msk.f32.vlgmr.msra.gmra.mrb[12].mxu1 %vm450_vm1, %v1607_v29 }
 0x4d6   : > { %1057 = vmatprep.mubr.f32.mxu1 %v1913_v4 }
 0x4d9   : > { %1612 = vmatmul.mubr.msk.f32.gmra.mrb[14].mxu1 %vm450_vm1, %v1608_v13 }
 0x4da   : > { %1197 = vmatprep.mubr.f32.mxu1 %v1913_v4 }
 0x5a8   : > { %v1053_v30 = vpop.f32.mrb[12].mxu1 }
 0x5a9   : > { %v1054_v31 = vadd.f32 %v1053_v30, %v974_v15  ;;  %v1055_v32 = vpop.f32.mrb[13].mxu1 }
 0x5aa   : > { %v1056_v33 = vadd.f32 %v1055_v32, %v974_v15 }
 0x5ab   : > { %v1064_v34 = vmul.f32 1.442695, %v1054_v31  ;;  %v1072_v35 = vrot.slane %v1054_v31, 4 }
 0x5ac   : > { %v1066_v36 = vmul.f32 1.442695, %v1056_v33  ;;  %v1078_v37 = vrot.slane %v1056_v33, 4  ;;  %v1059_v38 = vpop.f32.mrb[14].mxu1 }
 0x5ad   : > { %1793 = vpow2.f32 %v1064_v34  ;;  %v1073_v39 = vadd.f32 %v1072_v35, %v1054_v31  ;;  %v1061_v40 = vpop.f32.mrb[15].mxu1  ;;  %v1060_v57 = vadd.f32 %v1059_v38, %v979_v53  ;;  %v1239_v38 = vpop.permute.xlu0 %1238 }
 0x5ae   : > { %1795 = vpow2.f32 %v1066_v36  ;;  %v1079_v41 = vadd.f32 %v1078_v37, %v1056_v33  ;;  %v1062_v59 = vadd.f32 %v1061_v40, %v979_v53  ;;  %v1629_v36 = vld [vmem:[%s2408_s3 + $0x30] sm:$0xff]  ;;  %v1630_v37 = vld [vmem:[%s2408_s3 + $0x38] sm:$0xff] }
 0x5af   : > { %v1074_v42 = vrot.slane %v1073_v39, 2 }
 0x5b0   : > { %v1080_v44 = vrot.slane %v1079_v41, 2 }
 0x5b1   : > { %v1075_v46 = vadd.f32 %v1074_v42, %v1073_v39 }
 0x5b2   : > { %v1081_v47 = vadd.f32 %v1080_v44, %v1079_v41 }
 0x5b3   : > { %v1076_v48 = vrot.slane %v1075_v46, 1 }
 0x5b4   : > { %v1082_v49 = vrot.slane %v1081_v47, 1 }
 0x5b5   : > { %v1077_v52 = vadd.f32 %v1076_v48, %v1075_v46 }
 0x5b6   : > { %v1083_v8 = vadd.f32 %v1082_v49, %v1081_v47 }
 0x5b7   : > { %v1794_v9 = vpop.eup %1793  ;;  %v2249_v54 = vadd.f32 %v1077_v52, %v2198_v43  ;;  %v1617_v43 = vld [vmem:[%s2406_s1 + $0x60] sm:$0xff] }
 0x5b8   : > { %v1796_v55 = vpop.eup %1795  ;;  %v2252_v56 = vadd.f32 %v1083_v8, %v2200_v45  ;;  %v1068_v58 = vmul.f32 %v1794_v9, %v2150_v27  ;;  %v1618_v27 = vld [vmem:[%s2406_s1 + $0x68] sm:$0xff]  ;;  %v1620_v45 = vld [vmem:[%s2406_s1 + $0x78] sm:$0xff] }
 0x5b9   : > { %v1069_v60 = vmul.f32 %v1796_v55, %v2152_v28  ;;  %v1619_v28 = vld [vmem:[%s2406_s1 + $0x70] sm:$0xff]  ;;  %v1915_v55 = vmov 1966171168  }
 0x5ba   : > { %v2256_v61 = vadd.f32 %v1068_v58, %v1060_v57  ;;  %v1382_v57 = vunpack.c.l.s4 %v1915_v55  ;;  %v1384_v58 = vlaneseq }
 0x5bb   : > { %v2258_v62 = vadd.f32 %v1069_v60, %v1062_v59 }
 0x5bc   : > { %1615 = vst [vmem:[%s2035_s11 + $0x70] sm:$0xff] %v2256_v61  ;;  %1637 = vst [vmem:[%s2035_s11 + $0x90] sm:$0xff] %v2256_v61  ;;  %vm2321_vm2 = vcmp.lt.s32.totalorder %v1384_v58, 256 }
 0x5bd   : > { %1616 = vst [vmem:[%s2035_s11 + $0x78] sm:$0xff] %v2258_v62  ;;  %1638 = vst [vmem:[%s2035_s11 + $0x98] sm:$0xff] %v2258_v62  ;;  %1133 = vmatprep.subr.mxu1 %v2258_v62 }
 0x5be   : > { %1134 = vmatpush1.msra.mxu1 %v2256_v61 }
 0x5bf   : > { %1625 = vmatmul.mubr.msk.f32.vlgmr.msra.gmra.mrb[16].mxu1 %vm326_vm0, %v1617_v43 }
 0x5c0   : > { %1203 = vmatprep.mubr.f32.mxu1 %v1913_v4 }
 0x5c3   : > { %1626 = vmatmul.mubr.msk.f32.gmra.mrb[18].mxu1 %vm326_vm0, %v1618_v27 }
 0x5c4   : > { %1209 = vmatprep.mubr.f32.mxu1 %v1913_v4 }
 0x5c7   : > { %1627 = vmatmul.mubr.msk.f32.gmra.mrb[20].mxu1 %vm326_vm0, %v1619_v28  ;;  %v1383_v28 = vunpack.c.0.s8 %v1382_v57 }
 0x5c8   : > { %1215 = vmatprep.mubr.f32.mxu1 %v1913_v4 }
 0x5cb   : > { %1628 = vmatmul.mubr.msk.f32.gmra.mrb[22].mxu1 %vm326_vm0, %v1620_v45  ;;  %v1385_v45 = vshrl.u32 %v1384_v58, 7 }
 0x692   : > { %v1199_v0 = vpop.f32.mrb[16].mxu1 }
 0x693   : > { %v1200_v1 = vadd.f32 %v1199_v0, %v1104_v63  ;;  %v1201_v2 = vpop.f32.mrb[17].mxu1 }
 0x694   : > { %v1202_v3 = vadd.f32 %v1201_v2, %v1104_v63  ;;  %v1244_v2 = vpop.permute.xlu1 %1243 }
 0x695   : > { %1797 = vtanh.f32 %v1200_v1 }
 0x696   : > { %v1205_v6 = vpop.f32.mrb[18].mxu1  ;;  %1799 = vtanh.f32 %v1202_v3 }
 0x697   : > { %v1206_v7 = vadd.f32 %v1205_v6, %v1109_v5  ;;  %v1207_v10 = vpop.f32.mrb[19].mxu1 }
 0x698   : > { %v1208_v11 = vadd.f32 %v1207_v10, %v1109_v5 }
 0x699   : > { %1801 = vtanh.f32 %v1206_v7 }
 0x69a   : > { %1803 = vtanh.f32 %v1208_v11  ;;  %v1211_v14 = vpop.f32.mrb[20].mxu1  ;;  %v2303_v11 = vsub.s32 %v1383_v28, %v1385_v45 }
 0x69b   : > { %v1212_v16 = vadd.f32 %v1211_v14, %v1114_v12  ;;  %v1213_v17 = vpop.f32.mrb[21].mxu1 }
 0x69c   : > { %v1214_v18 = vadd.f32 %v1213_v17, %v1114_v12 }
 0x69d   : > { %1805 = vtanh.f32 %v1212_v16 }
 0x69e   : > { %v1217_v20 = vpop.f32.mrb[22].mxu1  ;;  %1807 = vtanh.f32 %v1214_v18 }
 0x69f   : > { %v1218_v21 = vadd.f32 %v1217_v20, %v1119_v19  ;;  %v1219_v22 = vpop.f32.mrb[23].mxu1  ;;  %v1798_v24 = vpop.eup %1797 }
 0x6a0   : > { %v1220_v23 = vadd.f32 %v1219_v22, %v1119_v19  ;;  %v1800_v25 = vpop.eup %1799  ;;  %v1359_v19 = vmul.f32 %v2258_v62, %v2258_v62 }
 0x6a1   : > { %1809 = vtanh.f32 %v1218_v21 }
 0x6a2   : > { %1811 = vtanh.f32 %v1220_v23 }
 0x6a3   : > { %v1802_v26 = vpop.eup %1801 }
 0x6a4   : > { %v1804_v29 = vpop.eup %1803  ;;  %v1678_v13 = vpack.c.bf16 %v1802_v26, %v1798_v24 }
 0x6a5   : > { %v1676_v15 = vpack.c.bf16 %v1804_v29, %v1800_v25 }
 0x6a7   : > { %1677 = vmatprep.subr.bf16.mxu0 %v1676_v15  ;;  %v1806_v30 = vpop.eup %1805 }
 0x6a8   : > { %1679 = vmatpush1.bf16.msra.mxu0 %v1678_v13  ;;  %v1808_v31 = vpop.eup %1807 }
 0x6ab   : > { %v1810_v32 = vpop.eup %1809 }
 0x6ac   : > { %v1812_v33 = vpop.eup %1811  ;;  %v1682_v34 = vpack.c.bf16 %v1810_v32, %v1806_v30 }
 0x6ad   : > { %v1680_v35 = vpack.c.bf16 %v1812_v33, %v1808_v31 }
 0x6af   : > { %1681 = vmatprep.subr.bf16.mxu0 %v1680_v35 }
 0x6b0   : > { %1683 = vmatpush1.bf16.msra.mxu0 %v1682_v34 }
 0x6b3   : > { %1633 = vmatmul.mubr.msk.f32.vlgmr.msra.gmra.mrb[20].mxu0 %vm450_vm1, %v1629_v36 }
 0x6b4   : > { %1322 = vmatprep.mubr.f32.mxu0 %v1913_v4 }
 0x6b7   : > { %1634 = vmatmul.mubr.msk.f32.gmra.mrb[22].mxu0 %vm450_vm1, %v1630_v37 }
 0x786   : > { %v1318_v39 = vpop.f32.mrb[20].mxu0 }
 0x787   : > { %v1319_v40 = vadd.f32 %v1318_v39, %v1239_v38  ;;  %v1320_v41 = vpop.f32.mrb[21].mxu0 }
 0x788   : > { %v1321_v42 = vadd.f32 %v1320_v41, %v1239_v38 }
 0x789   : > { %v1329_v44 = vmul.f32 1.442695, %v1319_v40  ;;  %v1337_v46 = vrot.slane %v1319_v40, 4 }
 0x78a   : > { %v1331_v47 = vmul.f32 1.442695, %v1321_v42  ;;  %v1343_v48 = vrot.slane %v1321_v42, 4  ;;  %v1324_v49 = vpop.f32.mrb[22].mxu0 }
 0x78b   : > { %1813 = vpow2.f32 %v1329_v44  ;;  %v1338_v52 = vadd.f32 %v1337_v46, %v1319_v40  ;;  %v1326_v8 = vpop.f32.mrb[23].mxu0  ;;  %v1325_v7 = vadd.f32 %v1324_v49, %v1244_v2 }
 0x78c   : > { %1815 = vpow2.f32 %v1331_v47  ;;  %v1344_v4 = vadd.f32 %v1343_v48, %v1321_v42  ;;  %v1327_v12 = vadd.f32 %v1326_v8, %v1244_v2 }
 0x78d   : > { %v1339_v9 = vrot.slane %v1338_v52, 2 }
 0x78e   : > { %v1345_v53 = vrot.slane %v1344_v4, 2 }
 0x78f   : > { %v1340_v59 = vadd.f32 %v1339_v9, %v1338_v52 }
 0x790   : > { %v1346_v60 = vadd.f32 %v1345_v53, %v1344_v4 }
 0x791   : > { %v1341_v43 = vrot.slane %v1340_v59, 1 }
 0x792   : > { %v1347_v27 = vrot.slane %v1346_v60, 1 }
 0x793   : > { %v1342_v63 = vadd.f32 %v1341_v43, %v1340_v59 }
 0x794   : > { %v1348_v0 = vadd.f32 %v1347_v27, %v1346_v60 }
 0x795   : > { %v1814_v1 = vpop.eup %1813  ;;  %v1349_v3 = vadd.f32 %v1342_v63, %v2249_v54 }
 0x796   : > { %v1816_v5 = vpop.eup %1815  ;;  %v1350_v6 = vadd.f32 %v1348_v0, %v2252_v56  ;;  %v1333_v10 = vmul.f32 %v1814_v1, %v2204_v50 }
 0x797   : > { %v1334_v14 = vmul.f32 %v1816_v5, %v2206_v51  ;;  %v1358_v51 = vmul.f32 %v2256_v61, %v2256_v61 }
 0x798   : > { %v1403_v54 = vcombine.low %v1349_v3, %v1350_v6  ;;  %v1335_v16 = vadd.f32 %v1333_v10, %v1325_v7 }
 0x799   : > { %v1336_v50 = vadd.f32 %v1334_v14, %v1327_v12 }
 0x79a   : > { %1635 = vst [vmem:[%s2035_s11 + $0x80] sm:$0xff] %v1335_v16  ;;  %v1356_v56 = vmul.f32 %v1335_v16, %v1335_v16  ;;  %v1410_v17 = vrot.slane %v1403_v54, %v2303_v11 }
 0x79b   : > { %1636 = vst [vmem:[%s2035_s11 + $0x88] sm:$0xff] %v1336_v50  ;;  %v1357_v18 = vmul.f32 %v1336_v50, %v1336_v50 }
 0x79c   : > { %v1360_v21 = vadd.f32 %v1358_v51, %v1356_v56 }
 0x79d   : > { %1830 = shalt.err (!%p1827_p5)
}
 0x79e   : > { %s1831_s11 = scalar_lea.hbm %s2309_s19, 2560  ;;  %s1835_s15 = scalar_lea.hbm %s2410_s5, 10240 }
 0x79f   : > { %p1832_p7 = scmp.ne.s32.totalorder %s2309_s19, %s1831_s11  ;;  %p1836_p11 = scmp.lt.u32.totalorder %s2309_s19, %s2410_s5 }
 0x7a0   : > { %p1837_p12 = scmp.lt.u32.totalorder %s1835_s15, %s1831_s11  ;;  %p1839_p0 = scmp.lt.u32.totalorder %s1831_s11, %s2309_s19 }
 0x7a1   : > { %p1833_p9 = pnand %p1832_p7, %p1995_p6 }
 0x7a2   : > { %p1838_p13 = por %p1837_p12, %p1836_p11 }
 0x7a3   : > { %p1834_p10 = pneg %p1833_p9 }
 0x7a4   : > { %p1840_p1 = por %p1839_p0, %p1838_p13 }
 0x7a6   : > { %p1841_p2 = pnand %p1840_p1, %p1834_p10 }
 0x7a8   : > { %1844 = shalt.err (!%p1841_p2)
}
 0x7a9   : > { %s1917_s28 = smov 256   ;;  %s1918_s9 = smov 1024   ;;  %v1417_v61 = vrot.slane %v1410_v17, %v2303_v11  ;;  %v1361_v62 = vadd.f32 %v1359_v19, %v1357_v18  ;;  %v1362_v22 = vrot.slane %v1360_v21, 4 }
 0x7aa   : > { %s1919_s10 = smov 16   ;;  %s286_s12 = scalar_lea.vmem [#allocation5], %s1562_s20 }
 0x7ab   : > { %1685 = dma.vmem_to_hbm [thread:$0]  (%p1995_p6), %s2312_s17, 2560, %s2309_s19, %s1422_s26, %s1917_s28, %s1918_s9, %s1919_s10   ;;  %v1368_v23 = vrot.slane %v1361_v62, 4  ;;  %v1363_v24 = vadd.f32 %v1362_v22, %v1360_v21 }
 0x7ac   : > { %1641 = vst.msk [vmem:[%s286_s12 + $0x1] ss:$2 sm:$0x3] %vm2321_vm2, %v1417_v61  ;;  %s1651_s17 = sshll.u32 %s1977_s25, 6  ;;  %s1457_s19 = sshll.u32 %s286_s12, 4  ;;  %s2362_s19 = int_to_ptr.vmem [resolvable:$true] %s1457_s19 }
 0x7ad   : > { %v1369_v25 = vadd.f32 %v1368_v23, %v1361_v62  ;;  %v1364_v26 = vrot.slane %v1363_v24, 2  ;;  %s2360_s11 = scalar_lea.hbm %s2411_s6, %s1651_s17  ;;  %s1427_s13 = scalar_lea.sflag [#allocation6], %s2012_s16 }
 0x7ae   : > { %s1845_s25 = scalar_lea.vmem %s2362_s19, 64  ;;  %s1920_s14 = smov [#allocation5]  }
 0x7af   : > { %v1370_v29 = vrot.slane %v1369_v25, 2  ;;  %v1365_v13 = vadd.f32 %v1364_v26, %v1363_v24  ;;  %p1846_p3 = scmp.ne.s32.totalorder %s2362_s19, %s1845_s25  ;;  %s1849_s15 = sshll.u32 %s1920_s14, 4  ;;  %s1850_s15 = int_to_ptr.vmem [resolvable:$false] %s1849_s15 }
 0x7b0   : > { %s1851_s18 = scalar_lea.vmem %s1850_s15, 128  ;;  %p1852_p7 = scmp.lt.s32.totalorder %s2362_s19, %s1850_s15 }
 0x7b1   : > { %v1371_v15 = vadd.f32 %v1370_v29, %v1369_v25  ;;  %v1366_v30 = vrot.slane %v1365_v13, 1  ;;  %p1847_p4 = pnand %p1846_p3, %p1995_p6  ;;  %p1853_p9 = scmp.lt.s32.totalorder %s1851_s18, %s1845_s25 }
 0x7b3   : > { %v1372_v31 = vrot.slane %v1371_v15, 1  ;;  %v1367_v32 = vadd.f32 %v1366_v30, %v1365_v13  ;;  %p1848_p5 = pneg %p1847_p4  ;;  %p1854_p10 = por %p1853_p9, %p1852_p7 }
 0x7b5   : > { %v1373_v33 = vadd.f32 %v1372_v31, %v1371_v15  ;;  %v1374_v34 = vmul.f32 -0.5, %v1367_v32  ;;  %p1855_p11 = pnand %p1854_p10, %p1848_p5 }
 0x7b7   : > { %v1375_v35 = vmul.f32 -0.5, %v1373_v33  ;;  %v1639_v36 = vadd.f32 -14.703016, %v1374_v34 }
 0x7b9   : > { %v1640_v37 = vadd.f32 -14.703016, %v1375_v35 }
 0x7bb   : > { %v1380_v38 = vcombine.low %v1639_v36, %v1640_v37 }
 0x7bd   : > { %v1387_v39 = vrot.slane %v1380_v38, %v2303_v11 }
 0x7bf   : > { %v1394_v40 = vrot.slane %v1387_v39, %v2303_v11 }
 0x7c1   : > { %1400 = vst.msk [vmem:[%s286_s12] ss:$2 sm:$0x3] %vm2321_vm2, %v1394_v40 }
 0x7c2   : > { %1858 = shalt.err (!%p1855_p11)
}
 0x7c3   : > { %s1859_s16 = scalar_lea.hbm %s2360_s11, 64  ;;  %s1863_s9 = scalar_lea.hbm %s2411_s6, 256 }
 0x7c4   : > { %p1860_p12 = scmp.ne.s32.totalorder %s2360_s11, %s1859_s16  ;;  %p1864_p1 = scmp.lt.u32.totalorder %s2360_s11, %s2411_s6 }
 0x7c5   : > { %p1865_p2 = scmp.lt.u32.totalorder %s1863_s9, %s1859_s16  ;;  %p1867_p4 = scmp.lt.u32.totalorder %s1859_s16, %s2360_s11 }
 0x7c6   : > { %p1861_p13 = pnand %p1860_p12, %p1995_p6 }
 0x7c7   : > { %p1866_p3 = por %p1865_p2, %p1864_p1 }
 0x7c8   : > { %p1862_p0 = pneg %p1861_p13 }
 0x7c9   : > { %p1868_p5 = por %p1867_p4, %p1866_p3 }
 0x7cb   : > { %p1869_p7 = pnand %p1868_p5, %p1862_p0 }
 0x7cd   : > { %1872 = shalt.err (!%p1869_p7)
}
 0x7ce   : > { %1686 = dma.vmem_to_hbm [thread:$0]  (%p1995_p6), %s2362_s19, 64, %s2360_s11, %s1427_s13  }
 0x7cf PF: > { %p1696_p9 = scmp.ge.s32.totalorder %s1911_s24, 2  ;;  %s1469_s17 = sand.u32 1, %s1899_s21  }
 0x7d0   : > { %s1470_s20 = scalar_lea.sflag [#allocation4], %s1469_s17 }
 0x7d1   : > { %p1690_p10 = pnand %p1696_p9, %p1999_p8 }
 0x7d3   : > { %1890 = dma.done.wait (!%p1690_p10), %s1470_s20, 2560  }
 0x7d4   : > { %1892 = vsyncadd (!%p1690_p10), %s1470_s20, 4294964736  ;;  %s1479_s26 = scalar_lea.sflag [#allocation6], %s1469_s17 }
 0x7d5   : > { %1894 = dma.done.wait (!%p1690_p10), %s1479_s26, 64  }
 0x7d6   : > { %1896 = vsyncadd (!%p1690_p10), %s1479_s26, 4294967232  ;;  %p20_p6 = scmp.ge.s32.totalorder %s1981_s27, 6   ;;  %s2416_s21 = smov %s1903_s22 }
 0x7d7   : > { %s2417_s22 = smov %s1907_s23  ;;  %s2418_s23 = smov %s1993_s30 }
 0x7d8   : > { %s2419_s24 = smov %s1981_s27  ;;  %22 = sbr.rel (!%p20_p6) target bundleno = 5 (0x5), region = 137 }
 0x7df   :  { %1484 = vsyncpa [#allocation4], 1 }
 0x7e0   :  { %1486 = vsyncpa [#allocation4 + $0x1], 1 }
 0x7e1   :  { %1487 = vsyncpa [#allocation6], 1 }
 0x7e2   :  { %1489 = vsyncpa [#allocation6 + $0x1], 1 }

</bundles_post_ra>
